<compile_context>
chip_gen: v7x
topology: tpu7x:2x2x1
jax: 0.10.0
libtpu: 0.0.40
codegen_flags: <defaults>
</compile_context>

<pallas_src>
import functools
import math

import jax
import jax.numpy as jnp
from jax.experimental import pallas as pl
from jax.experimental.pallas import tpu as pltpu


def _bernoulli_mask(shape, row_off, col_off, n_cols, seed_u32, p):
    """Bernoulli(p) mask from a stateless hash of the global (row, col) index.

    Pure jnp integer ops (VPU only); deterministic and grid-invariant: the
    value for a given global weight element is independent of tiling, so the
    same function serves as the in-kernel mask and the host-side reference.
    """
    rows = jax.lax.broadcasted_iota(jnp.uint32, (shape[0], 1), 0) + row_off
    cols = jax.lax.broadcasted_iota(jnp.uint32, (1, shape[1]), 1) + col_off
    # Per-row term computed on a (rows, 1) vector -> only one full-tile add.
    h = rows * jnp.uint32(n_cols) + seed_u32
    h = h + cols
    # murmur3 fmix32 avalanche.
    h = h ^ (h >> jnp.uint32(16))
    h = h * jnp.uint32(0x85EBCA6B)
    h = h ^ (h >> jnp.uint32(13))
    h = h * jnp.uint32(0xC2B2AE35)
    h = h ^ (h >> jnp.uint32(16))
    threshold = jnp.uint32(min(int(float(p) * 4294967296.0), 4294967295))
    return h < threshold  # True with probability ~p


def _mixlinear_kernel(*refs, mode, has_bias, p, n_cols, tn, tk):
    """mode in {"plain", "drop", "mix"}; refs laid out per `mixlinear_forward`."""
    idx = 0
    seed_ref = None
    if mode != "plain":
        seed_ref = refs[idx]
        idx += 1
    x_ref = refs[idx]
    w_ref = refs[idx + 1]
    idx += 2
    t_ref = None
    if mode == "mix":
        t_ref = refs[idx]
        idx += 1
    b_ref = None
    if has_bias:
        b_ref = refs[idx]
        idx += 1
    o_ref = refs[idx]
    acc_ref = refs[idx + 1]

    k = pl.program_id(1)
    nk = pl.num_programs(1)

    @pl.when(k == 0)
    def _():
        acc_ref[...] = jnp.zeros_like(acc_ref)

    x = x_ref[...]
    w = w_ref[...]

    if mode != "plain":
        seed = seed_ref[0].astype(jnp.uint32)
        row_off = (pl.program_id(0) * tn).astype(jnp.uint32)
        col_off = (k * tk).astype(jnp.uint32)
        m = _bernoulli_mask(w.shape, row_off, col_off, n_cols, seed, p)
        cdt = w.dtype
        inv1mp = jnp.asarray(1.0 / (1.0 - p), cdt)
        if mode == "drop":
            # target is None -> mix towards zero (weight dropout).
            w = jnp.where(m, jnp.asarray(0.0, cdt), w * inv1mp)
        else:
            t = t_ref[...]
            w = jnp.where(m, t, (w - jnp.asarray(p, cdt) * t) * inv1mp)

    # NT matmul: x (B, tk) @ W_mix (tn, tk)^T -> (B, tn), f32 accumulation.
    acc_ref[...] += jax.lax.dot_general(
        x, w,
        dimension_numbers=(((1,), (1,)), ((), ())),
        preferred_element_type=jnp.float32,
    )

    @pl.when(k == nk - 1)
    def _():
        y = acc_ref[...]
        if has_bias:
            y = y + b_ref[...].astype(jnp.float32)
        o_ref[...] = y.astype(o_ref.dtype)


def _pick_block(dim, preferred, unit):
    """Largest multiple of `unit` <= preferred that divides dim (else full dim)."""
    if dim <= preferred:
        return dim
    t = (preferred // unit) * unit
    while t >= unit:
        if dim % t == 0:
            return t
        t -= unit
    return dim  # no aligned divisor -> untiled along this axis


def mixlinear_forward(x, weight, bias=None, target=None, *,
                      p=0.0, training=True, seed=0,
                      block_n=256, block_k=512):
    """Pallas implementation of MixLinear.forward.

    x: (B, K); weight: (N, K) [PyTorch layout]; bias: (N,) or None;
    target: (N, K) or None (None == mixout towards zero, i.e. weight dropout).
    Supply a fresh `seed` every training step.
    """
    B, K = x.shape
    N, K2 = weight.shape
    if K != K2:
        raise ValueError("in_features mismatch")
    if p < 0.0 or p > 1.0:
        raise ValueError(f"mix probability must be in [0, 1], got {p}")
    out_dtype = x.dtype

    mixing = bool(training) and float(p) > 0.0
    use_target = mixing and (target is not None)
    has_bias = bias is not None
    if mixing and float(p) >= 1.0:
        raise ValueError("mixout requires p < 1 (division by 1 - p)")

    tn = _pick_block(N, block_n, 128)
    tk = _pick_block(K, block_k, 128)
    grid = (pl.cdiv(N, tn), pl.cdiv(K, tk))

    # --- BlockSpecs: N tiles "parallel", K tiles "arbitrary" (accumulator). ---
    x_spec = pl.BlockSpec((B, tk), lambda j, k: (0, k))
    w_spec = pl.BlockSpec((tn, tk), lambda j, k: (j, k))
    t_spec = pl.BlockSpec((tn, tk), lambda j, k: (j, k))
    b_spec = pl.BlockSpec((1, tn), lambda j, k: (0, j))
    o_spec = pl.BlockSpec((B, tn), lambda j, k: (0, j))
    seed_spec = pl.BlockSpec(memory_space=pltpu.MemorySpace.SMEM)
    out_shape = jax.ShapeDtypeStruct((B, N), out_dtype)
    scratch_shapes = [pltpu.VMEM((B, tn), jnp.float32)]

    mode = "mix" if use_target else ("drop" if mixing else "plain")

    # --- assemble args / specs (seed and target/bias only when needed). ---
    in_specs, args = [], []
    if mode != "plain":
        in_specs.append(seed_spec)
        args.append(jnp.asarray([seed], dtype=jnp.int32))
    in_specs += [x_spec, w_spec]
    args += [x, weight]
    if mode == "mix":
        in_specs.append(t_spec)
        args.append(target)
    if has_bias:
        in_specs.append(b_spec)
        args.append(bias.reshape(1, N))

    # --- VMEM budget (streamed tiles double-buffered once; 48 MiB cap fits v7x). ---
    w_item = jnp.dtype(weight.dtype).itemsize
    x_item = jnp.dtype(x.dtype).itemsize
    o_item = jnp.dtype(out_dtype).itemsize
    streamed = 2 * (tn * tk * w_item * (2 if use_target else 1)
                    + B * tk * x_item
                    + (tn * jnp.dtype(bias.dtype).itemsize if has_bias else 0))
    resident = B * tn * 4 + 2 * B * tn * o_item
    vmem_bytes = int(min(max(int(1.5 * (streamed + resident)), 16 * 2 ** 20),
                         48 * 2 ** 20))

    call_kwargs = {}
    if jax.devices()[0].platform == "tpu":
        call_kwargs["compiler_params"] = pltpu.CompilerParams(
            dimension_semantics=("parallel", "arbitrary"),
            vmem_limit_bytes=vmem_bytes,
        )

    kernel = functools.partial(
        _mixlinear_kernel, mode=mode, has_bias=has_bias,
        p=float(p), n_cols=K, tn=tn, tk=tk)

    return pl.pallas_call(
        kernel,
        grid=grid,
        out_shape=out_shape,
        in_specs=in_specs,
        out_specs=o_spec,
        scratch_shapes=scratch_shapes,
        **call_kwargs,
    )(*args)


if __name__ == "__main__":
    batch, in_features, out_features = 8, 512, 384

    key = jax.random.PRNGKey(0)
    kw, kb, kt, kx = jax.random.split(key, 4)

    # nn.Linear-style init: U(-1/sqrt(fan_in), 1/sqrt(fan_in)).
    bound = 1.0 / math.sqrt(in_features)
    weight = jax.random.uniform(
        kw, (out_features, in_features), jnp.float32, -bound, bound)
    bias = jax.random.uniform(kb, (out_features,), jnp.float32, -bound, bound)
    # "target" stands in for the pretrained weights the module would be given.
    target = jax.random.uniform(
        kt, (out_features, in_features), jnp.float32, -bound, bound)
    x = jax.random.normal(kx, (batch, in_features), jnp.float32)

    hi = jax.lax.Precision.HIGHEST

    # 1) eval path (training=False): mixout is the identity -> plain linear.
    y0 = jax.block_until_ready(
        mixlinear_forward(x, weight, bias, target, p=0.5, training=False,
                          block_n=256, block_k=256))
    y0_ref = jnp.dot(x, weight.T, precision=hi) + bias
    assert jnp.allclose(y0, y0_ref, rtol=2e-3, atol=2e-3), "eval path mismatch"

    # 2) training, p=0.5, with target -> compare against a pure-JAX reference
    #    that applies the same deterministic hash mask (K-tiled: 2 K steps).
    p, seed = 0.5, 1234
    y1 = jax.block_until_ready(
        mixlinear_forward(x, weight, bias, target, p=p, training=True,
                          seed=seed, block_n=128, block_k=256))
    m = _bernoulli_mask(weight.shape, jnp.uint32(0), jnp.uint32(0),
                        in_features, jnp.uint32(seed), p)
    w_mix_ref = jnp.where(m, target, (weight - p * target) * (1.0 / (1.0 - p)))
    y1_ref = jnp.dot(x, w_mix_ref.T, precision=hi) + bias
    assert jnp.allclose(y1, y1_ref, rtol=2e-3, atol=2e-3), "mixout path mismatch"
    frac = float(jnp.mean(m.astype(jnp.float32)))
    assert abs(frac - p) < 0.02, f"mask fraction {frac} far from p={p}"

    # 3) training, p=0.5, target=None (dropout-style mixout towards zero).
    y2 = jax.block_until_ready(
        mixlinear_forward(x, weight, bias, None, p=p, training=True,
                          seed=seed, block_n=128, block_k=256))
    w_drop_ref = jnp.where(m, 0.0, weight * (1.0 / (1.0 - p)))
    y2_ref = jnp.dot(x, w_drop_ref.T, precision=hi) + bias
    assert jnp.allclose(y2, y2_ref, rtol=2e-3, atol=2e-3), "dropout path mismatch"

    # 4) bias=None path (no bias DMA / epilogue add), different p and seed.
    p3, seed3 = 0.3, 7
    y3 = jax.block_until_ready(
        mixlinear_forward(x, weight, None, target, p=p3, training=True,
                          seed=seed3, block_n=256, block_k=512))
    m3 = _bernoulli_mask(weight.shape, jnp.uint32(0), jnp.uint32(0),
                         in_features, jnp.uint32(seed3), p3)
    w3_ref = jnp.where(m3, target, (weight - p3 * target) * (1.0 / (1.0 - p3)))
    y3_ref = jnp.dot(x, w3_ref.T, precision=hi)
    assert jnp.allclose(y3, y3_ref, rtol=2e-3, atol=2e-3), "no-bias path mismatch"

    print("KERNEL_OK")
</pallas_src>

<mosaic_0001>
module attributes {stable_mosaic.version = 11 : i64} {
  func.func @_mixlinear_kernel(%arg0: i32, %arg1: i32, %arg2: memref<8x256xf32, #tpu.memory_space<vmem>>, %arg3: memref<128x256xf32, #tpu.memory_space<vmem>>, %arg4: memref<1x128xf32, #tpu.memory_space<vmem>>, %arg5: memref<8x128xf32, #tpu.memory_space<vmem>>, %arg6: memref<8x128xf32, #tpu.memory_space<vmem>>) attributes {dimension_semantics = [#tpu.dimension_semantics<arbitrary>, #tpu.dimension_semantics<arbitrary>], iteration_bounds = array<i64: 3, 2>, scalar_prefetch = 0 : i64, scratch_operands = 1 : i64, tpu.core_type = #tpu.core_type<tc>, window_params = [{transform_indices = @transform_0, window_bounds = array<i64: 8, 256>}, {transform_indices = @transform_1, window_bounds = array<i64: 128, 256>}, {transform_indices = @transform_2, window_bounds = array<i64: 1, 128>}, {transform_indices = @transform_3, window_bounds = array<i64: 8, 128>}]} {
    %c0_i32 = arith.constant 0 : i32
    %0 = arith.cmpi eq, %arg1, %c0_i32 : i32
    %1 = arith.extui %0 : i1 to i32
    %c0_i32_0 = arith.constant 0 : i32
    %2 = arith.cmpi ne, %1, %c0_i32_0 : i32
    scf.if %2 {
      %cst_9 = arith.constant 0.000000e+00 : f32
      %12 = vector.broadcast %cst_9 : f32 to vector<8x128xf32>
      %c0_10 = arith.constant 0 : index
      %c0_11 = arith.constant 0 : index
      %13 = vector.load %arg6[%c0_10, %c0_11] : memref<8x128xf32, #tpu.memory_space<vmem>>, vector<8x128xf32>
      tpu.vector_store %arg6[%c0_10, %c0_11], %12 {strides = array<i32>} : memref<8x128xf32, #tpu.memory_space<vmem>>, vector<8x128xf32>,
    } else {
    }
    %c0 = arith.constant 0 : index
    %c0_1 = arith.constant 0 : index
    %3 = vector.load %arg2[%c0, %c0_1] : memref<8x256xf32, #tpu.memory_space<vmem>>, vector<8x256xf32>
    %c0_2 = arith.constant 0 : index
    %c0_3 = arith.constant 0 : index
    %4 = vector.load %arg3[%c0_2, %c0_3] : memref<128x256xf32, #tpu.memory_space<vmem>>, vector<128x256xf32>
    %c0_4 = arith.constant 0 : index
    %c0_5 = arith.constant 0 : index
    %5 = vector.load %arg6[%c0_4, %c0_5] : memref<8x128xf32, #tpu.memory_space<vmem>>, vector<8x128xf32>
    %cst = arith.constant dense<0.000000e+00> : vector<8x128xf32>
    %6 = tpu.matmul %3, %4, %cst {dimension_numbers = #tpu.dot_dimension_numbers<[1], [1], [0], [0], [0, 0, 1, 0], [], []>} : vector<8x256xf32>, vector<128x256xf32>, vector<8x128xf32> -> vector<8x128xf32>
    %7 = arith.addf %5, %6 : vector<8x128xf32>
    %c0_6 = arith.constant 0 : index
    %c0_7 = arith.constant 0 : index
    %8 = vector.load %arg6[%c0_6, %c0_7] : memref<8x128xf32, #tpu.memory_space<vmem>>, vector<8x128xf32>
    tpu.vector_store %arg6[%c0_6, %c0_7], %7 {strides = array<i32>} : memref<8x128xf32, #tpu.memory_space<vmem>>, vector<8x128xf32>,
    %c1_i32 = arith.constant 1 : i32
    %9 = arith.cmpi eq, %arg1, %c1_i32 : i32
    %10 = arith.extui %9 : i1 to i32
    %c0_i32_8 = arith.constant 0 : i32
    %11 = arith.cmpi ne, %10, %c0_i32_8 : i32
    scf.if %11 {
      %c0_9 = arith.constant 0 : index
      %c0_10 = arith.constant 0 : index
      %12 = vector.load %arg6[%c0_9, %c0_10] : memref<8x128xf32, #tpu.memory_space<vmem>>, vector<8x128xf32>
      %c0_11 = arith.constant 0 : index
      %c0_12 = arith.constant 0 : index
      %13 = vector.load %arg4[%c0_11, %c0_12] : memref<1x128xf32, #tpu.memory_space<vmem>>, vector<1x128xf32>
      %14 = vector.broadcast %13 : vector<1x128xf32> to vector<8x128xf32>
      %15 = arith.addf %12, %14 : vector<8x128xf32>
      %c0_13 = arith.constant 0 : index
      %c0_14 = arith.constant 0 : index
      %16 = vector.load %arg5[%c0_13, %c0_14] : memref<8x128xf32, #tpu.memory_space<vmem>>, vector<8x128xf32>
      tpu.vector_store %arg5[%c0_13, %c0_14], %15 {strides = array<i32>} : memref<8x128xf32, #tpu.memory_space<vmem>>, vector<8x128xf32>,
    } else {
    }
    return
  }
  func.func @transform_0(%arg0: i32, %arg1: i32) -> (i32, i32) {
    %c0_i32 = arith.constant 0 : i32
    %c0_i32_0 = arith.constant 0 : i32
    return %c0_i32, %arg1 : i32, i32
  }
  func.func @transform_1(%arg0: i32, %arg1: i32) -> (i32, i32) {
    %c0_i32 = arith.constant 0 : i32
    return %arg0, %arg1 : i32, i32
  }
  func.func @transform_2(%arg0: i32, %arg1: i32) -> (i32, i32) {
    %c0_i32 = arith.constant 0 : i32
    %c0_i32_0 = arith.constant 0 : i32
    return %c0_i32, %arg0 : i32, i32
  }
  func.func @transform_3(%arg0: i32, %arg1: i32) -> (i32, i32) {
    %c0_i32 = arith.constant 0 : i32
    %c0_i32_0 = arith.constant 0 : i32
    return %c0_i32, %arg0 : i32, i32
  }
}

</mosaic_0001>

<bundles_post_ra>
// kernel: tpu_custom_call.1
= control target key start
LH: loop header
LB: loop body
LE: loop exit
PB: predicated region body
PF: predicated region fallthrough
CT: control target
= control target key end

     0   :  { %s1345_s0 = inlined_call_operand.hbm [shape: f32[8,512], index: 0, kind: input, shape index: {}]   ;;  %s1346_s1 = inlined_call_operand.hbm [shape: f32[384,512], index: 1, kind: input, shape index: {}]   ;;  %s1347_s2 = inlined_call_operand.vmem [shape: f32[1,384], index: 2, kind: input, shape index: {}]   ;;  %s1348_s3 = inlined_call_operand.hbm [shape: f32[8,384], index: 3, kind: output, shape index: {}]  }
   0x1   :  { %1357 = sst [smem:[#allocation20_spill]] %s1345_s0 }
   0x2   :  { %8 = vsyncpa [#allocation4], 0 }
   0x3   :  { %10 = vsyncpa [#allocation4 + $0x1], 0 }
   0x4   :  { %11 = vsyncpa [#allocation7], 0 }
   0x5   :  { %13 = vsyncpa [#allocation7 + $0x1], 0 }
   0x6   :  { %14 = vsyncpa [#allocation5], 0 }
   0x7   :  { %16 = vsyncpa [#allocation5 + $0x1], 0  ;;  %s948_s12 = smov 0   ;;  %s950_s13 = smov 0  }
   0x8   :  { %s952_s14 = smov 0   ;;  %s954_s15 = smov 0  }
   0x9   :  { %s956_s16 = smov 0   ;;  %s958_s17 = smov 0  }
   0xa   :  { %s960_s18 = smov 0   ;;  %s962_s19 = smov 0  }
   0xb   :  { %s964_s20 = smov 0   ;;  %s966_s21 = smov 0  }
   0xc   :  { %s968_s22 = smov 0   ;;  %s970_s23 = smov 0  }
   0xd   :  { %s972_s24 = smov 0   ;;  %s974_s25 = smov 0  }
   0xe LB: > { %1358 = sst [smem:[#allocation12_spill]] %s875_s14  ;;  %s517_s26 = sadd.s32 4294967295, %s919_s25   ;;  %s919_s25 = sphi %s974_s25, %s22_s25   ;;  %s915_s24 = sphi %s972_s24, %s1392_s24   ;;  %s911_s23 = sphi %s970_s23, %s1402_s23   ;;  %s907_s22 = sphi %s968_s22, %s1390_s22   ;;  %s903_s21 = sphi %s966_s21, %s1401_s21   ;;  %s899_s20 = sphi %s964_s20, %s1389_s20   ;;  %s895_s19 = sphi %s962_s19, %s1400_s19   ;;  %s891_s18 = sphi %s960_s18, %s1399_s18   ;;  %s887_s17 = sphi %s958_s17, %s1398_s17   ;;  %s883_s16 = sphi %s956_s16, %s1397_s16   ;;  %s879_s15 = sphi %s954_s15, %s1396_s15   ;;  %s875_s14 = sphi %s952_s14, %s1386_s14   ;;  %s871_s13 = sphi %s950_s13, %s1395_s13   ;;  %s867_s12 = sphi %s948_s12, %s1394_s12  }
   0xf   : > { %1359 = sst [smem:[#allocation13_spill]] %s899_s20  ;;  %s31_s28 = sadd.s32 1, %s911_s23 }
  0x10   : > { %1360 = sst [smem:[#allocation14_spill]] %s915_s24  ;;  %s34_s29 = sadd.s32 1, %s915_s24 }
  0x11   : > { %p32_p0 = scmp.ge.s32.totalorder %s31_s28, 2  ;;  %s41_s30 = sadd.s32 1, %s899_s20 }
  0x12   : > { %p48_p1 = scmp.ne.s32.totalorder %s899_s20, %s895_s19  ;;  %p49_p2 = scmp.eq.s32.totalorder %s919_s25, 0 }
  0x13   : > { %s1404_s28 = smov (%p32_p0, %s31_s28), 0  ;;  %s1406_s29 = smov (!%p32_p0, %s34_s29), %s915_s24 }
  0x14   : > { %1361 = sst [smem:[#allocation15_spill]] %s1404_s28  ;;  %s38_s4 = ssub.s32 %s911_s23, %s1404_s28 }
  0x15   : > { %p1031_p3 = por %p49_p2, %p48_p1  ;;  %p36_p4 = scmp.ge.s32.totalorder %s1406_s29, 3 }
  0x16   : > { %p39_p5 = scmp.eq.s32.totalorder %s38_s4, 0  ;;  %p54_p6 = scmp.ne.s32.totalorder %s895_s19, %s891_s18 }
  0x17   : > { %p1038_p7 = scmp.eq.s32.totalorder %s517_s26, 0  ;;  %s1408_s29 = smov (%p36_p4, %s1406_s29), 0 }
  0x18   : > { %1364 = sst [smem:[#allocation16_spill]] %s1408_s29  ;;  %s64_s9 = ssub.s32 %s915_s24, %s1408_s29 }
  0x19   : > { %s1045_s7 = scalar_select %p39_p5, %s899_s20, %s41_s30  }
  0x1a   : > { %p1049_p8 = por %p1038_p7, %p54_p6  ;;  %s66_s10 = sor.u32 %s64_s9, %s38_s4 }
  0x1b   : > { %1365 = sst [smem:[#allocation17_spill]] %s1045_s7  ;;  %s69_s11 = sadd.s32 1, %s887_s17 }
  0x1c   : > { %s1366_s8 = scalar_select %p1049_p8, 1, 0 }
  0x1d   : > { %p67_p9 = scmp.eq.s32.totalorder %s66_s10, 0  ;;  %p76_p10 = scmp.ne.s32.totalorder %s887_s17, %s883_s16 }
  0x1e   : > { %p82_p11 = scmp.ne.s32.totalorder %s883_s16, %s879_s15  ;;  %p119_p12 = scmp.eq.s32.totalorder %s64_s9, 0 }
  0x1f   : > { %s1061_s18 = scalar_select %p67_p9, %s887_s17, %s69_s11  }
  0x20   : > { %p1065_p13 = por %p76_p10, %p49_p2  ;;  %p1071_p0 = por %p82_p11, %p1038_p7 }
  0x21   : > { %1367 = sst [smem:[#allocation18_spill]] %s1061_s18  ;;  %s121_s4 = sadd.s32 1, %s875_s14 }
  0x22   : > { %s1369_s27 = scalar_select %p1071_p0, 1, 0 }
  0x23   : > { %p131_p1 = scmp.ne.s32.totalorder %s875_s14, %s871_s13  ;;  %p132_p4 = scmp.eq.s32.totalorder %s517_s26, 5 }
  0x24   : > { %s1079_s10 = scalar_select %p119_p12, %s875_s14, %s121_s4  }
  0x25   : > { %p137_p5 = scmp.ne.s32.totalorder %s871_s13, %s867_s12  ;;  %s1371_s15 = sadd.s32 4294967294, %s919_s25  }
  0x26   : > { %1370 = sst [smem:[#allocation19_spill]] %s1079_s10  ;;  %p138_p2 = scmp.eq.s32.totalorder %s1371_s15, 5 }
  0x27   : > { %p1087_p6 = por %p132_p4, %p131_p1  ;;  %p591_p7 = scmp.lt.s32.totalorder %s919_s25, 6 }
  0x28   : > { %p1092_p9 = por %p138_p2, %p137_p5  ;;  %s158_s11 = sand.u32 1, %s899_s20  }
  0x29   : > { %s1372_s9 = scalar_select %p1087_p6, 1, 0 }
  0x2a   : > { %s1373_s6 = scalar_select %p1092_p9, 1, 0 }
  0x2b   : > { %s521_s29 = sshll.u32 %s158_s11, 4  ;;  %s540_s4 = sshll.u32 %s911_s23, 8 }
  0x2c   : > { %s1374_s0 = sld [smem:[#allocation20_spill]]  ;;  %s162_s15 = scalar_lea.vmem [#allocation3], %s521_s29 }
  0x2d   : > { %s170_s18 = sshll.u32 %s162_s15, 4  ;;  %p1107_p10 = pnand %p591_p7, %p1031_p3  ;;  %s1103_s18 = int_to_ptr.vmem [resolvable:$true] %s170_s18 }
  0x2e   : > { %p1114_p11 = pnand %p591_p7, %p1065_p13  ;;  %s159_s7 = scalar_lea.sflag [#allocation4], %s158_s11 }
  0x2f   : > { %p711_p4 = pneg %p1107_p10 }
  0x32   : > { %s1101_s26 = scalar_lea.hbm %s1374_s0, %s540_s4  ;;  %s714_s15 = scalar_lea.hbm %s1374_s0, 512 }
  0x33   : > { %s709_s29 = scalar_lea.hbm %s1101_s26, 256  ;;  %p715_p13 = scmp.lt.u32.totalorder %s1101_s26, %s1374_s0 }
  0x34   : > { %p710_p1 = scmp.ne.s32.totalorder %s1101_s26, %s709_s29  ;;  %p716_p2 = scmp.lt.u32.totalorder %s714_s15, %s709_s29 }
  0x35   : > { %p718_p12 = scmp.lt.u32.totalorder %s709_s29, %s1101_s26 }
  0x36   : > { %p712_p3 = pnand %p711_p4, %p710_p1  ;;  %p717_p7 = por %p716_p2, %p715_p13 }
  0x38   : > { %p713_p5 = pneg %p712_p3  ;;  %p719_p9 = por %p718_p12, %p717_p7 }
  0x3a   : > { %p720_p6 = pnand %p719_p9, %p713_p5 }
  0x3c   : > { %723 = shalt.err (!%p720_p6)
}
  0x3d   : > { %s724_s11 = scalar_lea.vmem %s1103_s18, 256  ;;  %s921_s5 = smov [#allocation3]  }
  0x3e   : > { %p725_p1 = scmp.ne.s32.totalorder %s1103_s18, %s724_s11  ;;  %s729_s4 = sshll.u32 %s921_s5, 4  ;;  %s730_s4 = int_to_ptr.vmem [resolvable:$false] %s729_s4 }
  0x3f   : > { %s731_s20 = scalar_lea.vmem %s730_s4, 512  ;;  %p732_p8 = scmp.lt.s32.totalorder %s1103_s18, %s730_s4 }
  0x40   : > { %p727_p3 = pnand %p725_p1, %p711_p4  ;;  %p733_p13 = scmp.lt.s32.totalorder %s731_s20, %s724_s11 }
  0x42   : > { %p728_p0 = pneg %p727_p3  ;;  %p734_p2 = por %p733_p13, %p732_p8 }
  0x44   : > { %p735_p12 = pnand %p734_p2, %p728_p0 }
  0x46   : > { %738 = shalt.err (!%p735_p12)
}
  0x47   : > { %583 = dma.hbm_to_vmem [thread:$0]  (!%p1107_p10), %s1101_s26, 256, %s1103_s18, %s159_s7  }
  0x48   : > { %p205_p6 = scmp.lt.s32.totalorder %s919_s25, 7  ;;  %s177_s29 = sand.u32 1, %s887_s17  }
  0x49   : > { %s541_s15 = sshll.u32 %s915_s24, 6  ;;  %p1377_p9 = scmp.ge.s32.totalorder %s919_s25, 1 }
  0x4a   : > { %s524_s11 = sshll.u32 %s177_s29, 8  ;;  %s1379_s10 = sshll.u32 %s911_s23, 1 }
  0x4b   : > { %p1149_p4 = pnand %p1377_p9, %p205_p6  ;;  %s188_s5 = sadd.s32 %s541_s15, %s1379_s10 }
  0x4c   : > { %s528_s4 = sshll.u32 %s188_s5, 7  ;;  %s181_s18 = scalar_lea.vmem [#allocation6], %s524_s11 }
  0x4d   : > { %s1158_s14 = scalar_lea.hbm %s1346_s1, %s528_s4  ;;  %s191_s26 = sshll.u32 %s181_s18, 4  ;;  %s1160_s26 = int_to_ptr.vmem [resolvable:$true] %s191_s26 }
  0x4e   : > { %s1162_s7 = scalar_lea.sflag [#allocation7], %s177_s29  ;;  %s739_s24 = scalar_lea.hbm %s1158_s14, 4096 }
  0x4f   : > { %p740_p8 = scmp.ne.s32.totalorder %s1158_s14, %s739_s24  ;;  %p741_p0 = pneg %p1114_p11 }
  0x50   : > { %s744_s10 = scalar_lea.hbm %s1346_s1, 24576  ;;  %p745_p7 = scmp.lt.u32.totalorder %s1158_s14, %s1346_s1 }
  0x51   : > { %p742_p10 = pnand %p741_p0, %p740_p8  ;;  %p746_p1 = scmp.lt.u32.totalorder %s744_s10, %s739_s24 }
  0x52   : > { %p748_p13 = scmp.lt.u32.totalorder %s739_s24, %s1158_s14 }
  0x53   : > { %p743_p5 = pneg %p742_p10  ;;  %p747_p3 = por %p746_p1, %p745_p7 }
  0x55   : > { %p749_p2 = por %p748_p13, %p747_p3 }
  0x57   : > { %p750_p12 = pnand %p749_p2, %p743_p5 }
  0x59   : > { %753 = shalt.err (!%p750_p12)
}
  0x5a   : > { %s754_s29 = scalar_lea.vmem %s1160_s26, 4096  ;;  %s922_s11 = smov [#allocation6]  }
  0x5b   : > { %p755_p6 = scmp.ne.s32.totalorder %s1160_s26, %s754_s29  ;;  %s759_s20 = sshll.u32 %s922_s11, 4  ;;  %s760_s20 = int_to_ptr.vmem [resolvable:$false] %s759_s20 }
  0x5c   : > { %s761_s18 = scalar_lea.vmem %s760_s20, 8192  ;;  %p762_p10 = scmp.lt.s32.totalorder %s1160_s26, %s760_s20 }
  0x5d   : > { %p757_p9 = pnand %p755_p6, %p741_p0  ;;  %p763_p7 = scmp.lt.s32.totalorder %s761_s18, %s754_s29 }
  0x5f   : > { %p758_p8 = pneg %p757_p9  ;;  %p764_p1 = por %p763_p7, %p762_p10 }
  0x61   : > { %p765_p3 = pnand %p764_p1, %p758_p8 }
  0x63   : > { %768 = shalt.err (!%p765_p3)
}
  0x64   : > { %s923_s24 = smov 512   ;;  %s924_s0 = smov 256  }
  0x65   : > { %s925_s15 = smov 16   ;;  %209 = sbr.rel (%p1149_p4) target bundleno = 440 (0x1b8), region = 32 }
  0x66   : > { %586 = dma.hbm_to_vmem [thread:$0]  (!%p1114_p11), %s1158_s14, 4096, %s1160_s26, %s1162_s7, %s923_s24, %s924_s0, %s925_s15  }
  0x67   : > { %s211_s10 = sand.u32 (!%p1149_p4), 1, %s895_s19   ;;  %p1380_p0 = scmp.ne.s32.totalorder (!%p1149_p4), %s1366_s8, 0 }
  0x68   : > { %s1193_s5 = sshll.u32 (!%p1149_p4), %s211_s10, 4  ;;  %s212_s4 = scalar_lea.sflag (!%p1149_p4), [#allocation4], %s211_s10 }
  0x69   : > { %s215_s29 = scalar_lea.vmem (!%p1149_p4), [#allocation3], %s1193_s5 }
  0x6c   : > { %854 = dma.done.wait (%p1380_p0), %s212_s4, 256  }
  0x6d   : > { %856 = vsyncadd (%p1380_p0), %s212_s4, 4294967040  ;;  %s220_s28 = sand.u32 1, %s883_s16   ;;  %p1381_p11 = scmp.ne.s32.totalorder %s1369_s27, 0 }
  0x6e   : > { %s531_s14 = sshll.u32 %s220_s28, 8  ;;  %s221_s26 = scalar_lea.sflag [#allocation7], %s220_s28 }
  0x6f   : > { %s1201_s30 = scalar_lea.vmem [#allocation6], %s531_s14 }
  0x70   : > { %858 = dma.done.wait (%p1381_p11), %s221_s26, 4096  }
  0x71   : > { %860 = vsyncadd (%p1381_p11), %s221_s26, 4294963200  ;;  %s252_s7 = sand.u32 1, %s871_s13   ;;  %p258_p4 = scmp.lt.s32.totalorder %s907_s22, 2 }
  0x72   : > { %s1211_s8 = sshll.u32 %s252_s7, 3  ;;  %p533_p5 = scmp.ne.s32.totalorder %s903_s21, 0 }
  0x73   : > { %s1214_s11 = scalar_select %p258_p4, %s907_s22, 2 }
  0x74   : > { %s254_s0 = scalar_lea.vmem [#allocation8], %s1211_s8  ;;  %264 = sbr.rel (%p533_p5) target bundleno = 123 (0x7b), region = 44  ;;  %v926_v0 = vmov (!%p533_p5), 0.0  }
  0x75   : > { %s260_s24 = scalar_lea.vmem %s1347_s2, %s1214_s11  ;;  %265 = vst [vmem:[#allocation2] sm:$0xff] (!%p533_p5), %v926_v0 }
  0x7b PF: > { %v269_v1 = vld [vmem:[%s1201_s30 + $0x8] sm:$0xff]  ;;  %v271_v2 = vld [vmem:[%s1201_s30 + $0x18] sm:$0xff]  ;;  %v268_v3 = vld [vmem:[%s1201_s30] sm:$0xff]  ;;  %p534_p13 = scmp.ne.s32.totalorder %s903_s21, 1 }
  0x7c   : > { %v542_v4 = vpack.c.bf16 %v271_v2, %v269_v1  ;;  %v270_v5 = vld [vmem:[%s1201_s30 + $0x10] sm:$0xff]  ;;  %v273_v6 = vld [vmem:[%s1201_s30 + $0x28] sm:$0xff]  ;;  %v275_v7 = vld [vmem:[%s1201_s30 + $0x38] sm:$0xff] }
  0x7d   : > { %v544_v8 = vpack.c.bf16 %v270_v5, %v268_v3  ;;  %v546_v9 = vpack.c.bf16 %v275_v7, %v273_v6  ;;  %v272_v10 = vld [vmem:[%s1201_s30 + $0x20] sm:$0xff]  ;;  %v274_v11 = vld [vmem:[%s1201_s30 + $0x30] sm:$0xff]  ;;  %v277_v12 = vld [vmem:[%s1201_s30 + $0x48] sm:$0xff] }
  0x7e   : > { %543 = vmatprep.subr.bf16.mxu0 %v542_v4  ;;  %v279_v13 = vld [vmem:[%s1201_s30 + $0x58] sm:$0xff]  ;;  %v548_v14 = vpack.c.bf16 %v274_v11, %v272_v10  ;;  %v276_v17 = vld [vmem:[%s1201_s30 + $0x40] sm:$0xff]  ;;  %v278_v18 = vld [vmem:[%s1201_s30 + $0x50] sm:$0xff] }
  0x7f   : > { %545 = vmatpush1.bf16.xpose.msra.mxu0 %v544_v8  ;;  %v550_v15 = vpack.c.bf16 %v279_v13, %v277_v12  ;;  %v267_v16 = vld [vmem:[%s215_s29 + $0x8] sm:$0xff]  ;;  %v552_v21 = vpack.c.bf16 %v278_v18, %v276_v17  ;;  %v280_v23 = vld [vmem:[%s1201_s30 + $0x60] sm:$0xff]  ;;  %v282_v24 = vld [vmem:[%s1201_s30 + $0x70] sm:$0xff] }
  0x80   : > { %547 = vmatprep.subr.bf16.mxu0 %v546_v9  ;;  %365 = vmatprep.mubr.f32.mxu0 %v267_v16  ;;  %v281_v19 = vld [vmem:[%s1201_s30 + $0x68] sm:$0xff]  ;;  %v283_v20 = vld [vmem:[%s1201_s30 + $0x78] sm:$0xff]  ;;  %v556_v27 = vpack.c.bf16 %v282_v24, %v280_v23  ;;  %v284_v29 = vld [vmem:[%s1201_s30 + $0x80] sm:$0xff] }
  0x81   : > { %v554_v22 = vpack.c.bf16 %v283_v20, %v281_v19  ;;  %v285_v25 = vld [vmem:[%s1201_s30 + $0x88] sm:$0xff]  ;;  %v287_v26 = vld [vmem:[%s1201_s30 + $0x98] sm:$0xff]  ;;  %v286_v30 = vld [vmem:[%s1201_s30 + $0x90] sm:$0xff] }
  0x82   : > { %v558_v28 = vpack.c.bf16 %v287_v26, %v285_v25  ;;  %v289_v31 = vld [vmem:[%s1201_s30 + $0xa8] sm:$0xff]  ;;  %v291_v32 = vld [vmem:[%s1201_s30 + $0xb8] sm:$0xff]  ;;  %v560_v33 = vpack.c.bf16 %v286_v30, %v284_v29  ;;  %v288_v35 = vld [vmem:[%s1201_s30 + $0xa0] sm:$0xff] }
  0x83   : > { %v562_v34 = vpack.c.bf16 %v291_v32, %v289_v31  ;;  %v290_v36 = vld [vmem:[%s1201_s30 + $0xb0] sm:$0xff]  ;;  %v293_v37 = vld [vmem:[%s1201_s30 + $0xc8] sm:$0xff]  ;;  %v295_v38 = vld [vmem:[%s1201_s30 + $0xd8] sm:$0xff] }
  0x84   : > { %v564_v39 = vpack.c.bf16 %v290_v36, %v288_v35  ;;  %v566_v40 = vpack.c.bf16 %v295_v38, %v293_v37  ;;  %v292_v41 = vld [vmem:[%s1201_s30 + $0xc0] sm:$0xff]  ;;  %v294_v42 = vld [vmem:[%s1201_s30 + $0xd0] sm:$0xff]  ;;  %v297_v43 = vld [vmem:[%s1201_s30 + $0xe8] sm:$0xff] }
  0x85   : > { %v299_v44 = vld [vmem:[%s1201_s30 + $0xf8] sm:$0xff]  ;;  %v568_v45 = vpack.c.bf16 %v294_v42, %v292_v41  ;;  %v296_v47 = vld [vmem:[%s1201_s30 + $0xe0] sm:$0xff]  ;;  %v298_v48 = vld [vmem:[%s1201_s30 + $0xf0] sm:$0xff] }
  0x86   : > { %v570_v46 = vpack.c.bf16 %v299_v44, %v297_v43  ;;  %v572_v49 = vpack.c.bf16 %v298_v48, %v296_v47  ;;  %v266_v50 = vld [vmem:[%s215_s29] sm:$0xff]  ;;  %v300_v51 = vld [vmem:[#allocation2] sm:$0xff] }
  0x87   : > { %549 = vmatpush1.bf16.xpose.msra.mxu0 %v548_v14  ;;  %v535_v56 = vld [vmem:[%s260_s24] ss:$0 sm:$0xff] (!%p534_p13) }
  0x88   : > { %551 = vmatprep.subr.bf16.mxu0 %v550_v15 }
  0x8f   : > { %553 = vmatpush1.bf16.xpose.msra.mxu0 %v552_v21 }
  0x90   : > { %555 = vmatprep.subr.bf16.mxu0 %v554_v22 }
  0x97   : > { %557 = vmatpush1.bf16.xpose.msra.mxu0 %v556_v27 }
  0x98   : > { %559 = vmatprep.subr.bf16.mxu0 %v558_v28 }
  0x9f   : > { %561 = vmatpush1.bf16.xpose.msra.mxu0 %v560_v33 }
  0xa0   : > { %563 = vmatprep.subr.bf16.mxu0 %v562_v34 }
  0xa7   : > { %565 = vmatpush1.bf16.xpose.msra.mxu0 %v564_v39 }
  0xa8   : > { %567 = vmatprep.subr.bf16.mxu0 %v566_v40 }
  0xaf   : > { %569 = vmatpush1.bf16.xpose.msra.mxu0 %v568_v45 }
  0xb0   : > { %571 = vmatprep.subr.bf16.mxu0 %v570_v46 }
  0xb7   : > { %573 = vmatpush1.bf16.xpose.msra.mxu0 %v572_v49 }
  0xbe   : > { %366 = vmatmul.mubr.f32.vlgmr.msra.gmra.mrb[0].mxu0 %v266_v50 }
 0x18e   : > { %376 = sbr.rel (%p534_p13) target bundleno = 415 (0x19f), region = 48 }
 0x191   : > { %v367_v52 = vpop.f32.mrb[0].mxu0 }
 0x192   : > { %v371_v53 = vadd.f32 %v367_v52, %v300_v51  ;;  %v369_v54 = vpop.f32.mrb[1].mxu0 }
 0x194   : > { %372 = vst [vmem:[#allocation2] sm:$0xff] %v371_v53 }
 0x19b   : > { %v377_v55 = vld [vmem:[#allocation2] sm:$0xff] }
 0x19c   : > { %v385_v57 = vadd.f32 %v535_v56, %v377_v55 }
 0x19e   : > { %386 = vst [vmem:[%s254_s0] sm:$0xff] %v385_v57 }
 0x19f PF: > { %s537_s10 = sshll.u32 %s907_s22, 7  ;;  %s401_s29 = sshll.u32 %s254_s0, 4  ;;  %s402_s29 = int_to_ptr.vmem [resolvable:$true] %s401_s29 }
 0x1a0   : > { %s1270_s4 = scalar_lea.hbm %s1348_s3, %s537_s10  ;;  %s388_s28 = scalar_lea.sflag [#allocation5], %s252_s7 }
 0x1a1   : > { %s769_s14 = scalar_lea.vmem %s402_s29, 128  ;;  %p1382_p12 = scmp.ne.s32.totalorder %s1372_s9, 0 }
 0x1a2   : > { %p770_p2 = scmp.ne.s32.totalorder %s402_s29, %s769_s14  ;;  %s927_s26 = smov [#allocation8]  }
 0x1a3   : > { %s773_s30 = sshll.u32 %s927_s26, 4  ;;  %s774_s30 = int_to_ptr.vmem [resolvable:$false] %s773_s30 }
 0x1a4   : > { %p771_p6 = pnand %p770_p2, %p1382_p12  ;;  %s775_s11 = scalar_lea.vmem %s774_s30, 256 }
 0x1a5   : > { %p776_p8 = scmp.lt.s32.totalorder %s402_s29, %s774_s30  ;;  %p777_p10 = scmp.lt.s32.totalorder %s775_s11, %s769_s14 }
 0x1a6   : > { %p772_p9 = pneg %p771_p6 }
 0x1a7   : > { %p778_p7 = por %p777_p10, %p776_p8 }
 0x1a9   : > { %p779_p1 = pnand %p778_p7, %p772_p9 }
 0x1ab   : > { %782 = shalt.err (!%p779_p1)
}
 0x1ac   : > { %s783_s22 = scalar_lea.hbm %s1270_s4, 128  ;;  %s787_s20 = scalar_lea.hbm %s1348_s3, 384 }
 0x1ad   : > { %p784_p3 = scmp.ne.s32.totalorder %s1270_s4, %s783_s22  ;;  %p788_p4 = scmp.lt.u32.totalorder %s1270_s4, %s1348_s3 }
 0x1ae   : > { %p789_p5 = scmp.lt.u32.totalorder %s787_s20, %s783_s22  ;;  %p791_p2 = scmp.lt.u32.totalorder %s783_s22, %s1270_s4 }
 0x1af   : > { %p785_p0 = pnand %p784_p3, %p1382_p12 }
 0x1b0   : > { %p790_p13 = por %p789_p5, %p788_p4 }
 0x1b1   : > { %p786_p11 = pneg %p785_p0 }
 0x1b2   : > { %p792_p6 = por %p791_p2, %p790_p13 }
 0x1b4   : > { %p793_p9 = pnand %p792_p6, %p786_p11 }
 0x1b6   : > { %796 = shalt.err (!%p793_p9)
}
 0x1b7   : > { %578 = dma.vmem_to_hbm [thread:$0]  (%p1382_p12), %s402_s29, 128, %s1270_s4, %s388_s28  }
 0x1b8 PF: > { %p592_p8 = scmp.ge.s32.totalorder %s919_s25, 2  ;;  %s413_s0 = sand.u32 1, %s867_s12  }
 0x1b9   : > { %p1383_p10 = scmp.ne.s32.totalorder %s1373_s6, 0  ;;  %s414_s27 = scalar_lea.sflag [#allocation5], %s413_s0 }
 0x1bb   : > { %p588_p7 = pnand %p592_p8, %p1383_p10 }
 0x1bd   : > { %862 = dma.done.wait (!%p588_p7), %s414_s27, 128  }
 0x1be   : > { %864 = vsyncadd (!%p588_p7), %s414_s27, 4294967168  ;;  %s22_s25 = sadd.s32 1, %s919_s25   ;;  %s1385_s9 = sld [smem:[#allocation12_spill]] }
 0x1bf   : > { %p1298_p1 = scmp.ge.s32.totalorder %s22_s25, 8   ;;  %s1386_s14 = sld [smem:[#allocation19_spill]] }
 0x1c0   : > { %s1387_s10 = sld [smem:[#allocation18_spill]]  ;;  %s1388_s5 = sld [smem:[#allocation13_spill]] }
 0x1c1   : > { %s1389_s20 = sld [smem:[#allocation17_spill]]  ;;  %s1390_s22 = sld [smem:[#allocation14_spill]] }
 0x1c2   : > { %s1391_s6 = sld [smem:[#allocation15_spill]]  ;;  %s1392_s24 = sld [smem:[#allocation16_spill]] }
 0x1c3   : > { %s1394_s12 = smov %s871_s13  ;;  %s1396_s15 = smov %s883_s16 }
 0x1c4   : > { %s1395_s13 = smov %s1385_s9  ;;  %s1397_s16 = smov %s887_s17 }
 0x1c5   : > { %s1399_s18 = smov %s895_s19  ;;  %s1401_s21 = smov %s911_s23 }
 0x1c6   : > { %s1398_s17 = smov %s1387_s10  ;;  %s1400_s19 = smov %s1388_s5 }
 0x1c7   :  { %21 = sbr.rel (!%p1298_p1) target bundleno = 14 (0xe), region = 101 }
 0x1c8   : > { %s1402_s23 = smov %s1391_s6 }
 0x1ce   :  { %419 = vsyncpa [#allocation4], 1 }
 0x1cf   :  { %421 = vsyncpa [#allocation4 + $0x1], 1 }
 0x1d0   :  { %422 = vsyncpa [#allocation7], 1 }
 0x1d1   :  { %424 = vsyncpa [#allocation7 + $0x1], 1 }
 0x1d2   :  { %425 = vsyncpa [#allocation5], 1 }
 0x1d3   :  { %427 = vsyncpa [#allocation5 + $0x1], 1 }

</bundles_post_ra>
